<compile_context>
chip_gen: v7x
topology: tpu7x:2x2x1
jax: 0.10.0
libtpu: 0.0.40
codegen_flags: <defaults>
</compile_context>

<pallas_src>
import functools

import jax
import jax.numpy as jnp
from jax.experimental import pallas as pl
from jax.experimental.pallas import tpu as pltpu


# ---------------------------------------------------------------------------
# Generation-aware VMEM budgets.
# ---------------------------------------------------------------------------
@functools.lru_cache(maxsize=1)
def _vmem_limit_bytes():
    phys = 64 << 20                       # conservative default (v7x-sized)
    try:
        info = pltpu.get_tpu_info()
        phys = int(getattr(info, "vmem_capacity_bytes", phys)) or phys
    except Exception:
        pass
    # Leave ~25% headroom for compiler scratch; never ask for more than 96 MiB.
    return min(phys * 3 // 4, 96 << 20)


def _budgets():
    limit = _vmem_limit_bytes()
    headroom = 4 << 20
    # Fused path: the x-in and out slabs are each double-buffered (~4x slab).
    fused_slab = max(2 << 20, min((limit - headroom) // 4, 16 << 20))
    # Streaming path: the apply kernel holds ~4x the L-tile (in + out, 2 bufs).
    l_tile = max(1 << 20, min((limit - headroom) // 5, 8 << 20))
    return limit, fused_slab, l_tile


# ---------------------------------------------------------------------------
# Fused path: one grid step per batch tile, single pass over x.
# ---------------------------------------------------------------------------
def _se_fused_kernel(x_ref, w1t_ref, w2t_ref, o_ref, *, inv_l):
    # Squeeze: mean over length, f32 accumulation.  x_ref is re-indexed at each
    # use (reduce + scale) so the whole slab never has to stay live in vregs.
    y = jnp.sum(x_ref[...], axis=-1, dtype=jnp.float32) * inv_l          # (tb, c)
    # Excitation: Linear(c -> c//r, no bias) -> ReLU -> Linear(c//r -> c) -> sigmoid.
    h = jnp.maximum(
        jnp.dot(y, w1t_ref[...], preferred_element_type=jnp.float32), 0.0)
    s = jax.nn.sigmoid(
        jnp.dot(h, w2t_ref[...], preferred_element_type=jnp.float32))    # (tb, c)
    # Scale: broadcast multiply in the native dtype (no f32 upcast of the slab).
    # A ragged last batch tile only produces garbage in rows whose writes are
    # dropped; valid rows are unaffected (row-independent op).
    o_ref[...] = x_ref[...] * s[:, :, None].astype(o_ref.dtype)


def _se_fused(x, w1t, w2t, tb, vmem_limit):
    bs, c, L = x.shape
    c_r = w1t.shape[1]
    nb = pl.cdiv(bs, tb)
    itemsize = jnp.dtype(x.dtype).itemsize
    kernel = functools.partial(_se_fused_kernel, inv_l=1.0 / L)
    cost = pl.CostEstimate(
        flops=int(2 * bs * c * L + 4 * bs * c * c_r),
        transcendentals=int(bs * c),
        bytes_accessed=int(2 * bs * c * L * itemsize + (w1t.size + w2t.size) * 4),
    )
    return pl.pallas_call(
        kernel,
        out_shape=jax.ShapeDtypeStruct((bs, c, L), x.dtype),
        grid_spec=pltpu.PrefetchScalarGridSpec(
            num_scalar_prefetch=0,
            grid=(nb,),
            in_specs=[
                pl.BlockSpec((tb, c, L), lambda b: (b, 0, 0)),
                pl.BlockSpec((c, c_r), lambda b: (0, 0)),
                pl.BlockSpec((c_r, c), lambda b: (0, 0)),
            ],
            out_specs=pl.BlockSpec((tb, c, L), lambda b: (b, 0, 0)),
        ),
        compiler_params=pltpu.CompilerParams(
            dimension_semantics=("parallel",),
            vmem_limit_bytes=vmem_limit),
        cost_estimate=cost,
    )(x, w1t, w2t)


# ---------------------------------------------------------------------------
# Two-pass path for large c*L.
# ---------------------------------------------------------------------------
def _pick_l_tile(L, c, itemsize, budget_bytes):
    """Largest 128-multiple length tile whose (c, tl) slab fits the budget."""
    max_tl = max(128, (budget_bytes // max(1, c * itemsize)) // 128 * 128)
    l_padded = max(128, pl.cdiv(L, 128) * 128)
    return min(max_tl, l_padded)


def _se_sum_kernel(x_ref, sum_ref, *, tl, L, need_mask):
    j = pl.program_id(1)

    @pl.when(j == 0)
    def _init():
        sum_ref[...] = jnp.zeros_like(sum_ref)

    x = x_ref[...]                                            # (1, c, tl), native
    if need_mask:
        # Ragged last tile: zero the out-of-range lanes before reducing.
        lane = jax.lax.broadcasted_iota(jnp.int32, x.shape, 2)
        x = jnp.where(lane + j * tl < L, x, jnp.zeros((), x.dtype))
    # Partial sum over this length tile, accumulated in f32 directly into the
    # resident output block (same block index for every j -> accumulator).
    sum_ref[...] += jnp.sum(x, axis=-1, dtype=jnp.float32, keepdims=True)


def _se_sums(x, tl, vmem_limit):
    bs, c, L = x.shape
    nl = pl.cdiv(L, tl)
    itemsize = jnp.dtype(x.dtype).itemsize
    kernel = functools.partial(_se_sum_kernel, tl=tl, L=L, need_mask=(L % tl != 0))
    cost = pl.CostEstimate(
        flops=int(bs * c * L),
        transcendentals=0,
        bytes_accessed=int(bs * c * L * itemsize + bs * c * 4),
    )
    return pl.pallas_call(
        kernel,
        out_shape=jax.ShapeDtypeStruct((bs, c, 1), jnp.float32),
        grid_spec=pltpu.PrefetchScalarGridSpec(
            num_scalar_prefetch=0,
            grid=(bs, nl),
            in_specs=[pl.BlockSpec((1, c, tl), lambda b, j: (b, 0, j))],
            out_specs=pl.BlockSpec((1, c, 1), lambda b, j: (b, 0, 0)),
        ),
        compiler_params=pltpu.CompilerParams(
            dimension_semantics=("parallel", "arbitrary"),
            vmem_limit_bytes=vmem_limit),
        cost_estimate=cost,
    )(x)


def _se_apply_kernel(x_ref, s_ref, o_ref):
    # Pure streaming: out = x * s broadcast over the length tile, native dtype.
    # A ragged last tile needs no mask: out-of-range columns hold garbage whose
    # writeback Pallas drops.
    o_ref[...] = x_ref[...] * s_ref[...].astype(o_ref.dtype)


def _se_apply(x, s, tl, vmem_limit):
    bs, c, L = x.shape
    nl = pl.cdiv(L, tl)
    itemsize = jnp.dtype(x.dtype).itemsize
    cost = pl.CostEstimate(
        flops=int(bs * c * L),
        transcendentals=0,
        bytes_accessed=int(2 * bs * c * L * itemsize + bs * c * 4),
    )
    return pl.pallas_call(
        _se_apply_kernel,
        out_shape=jax.ShapeDtypeStruct((bs, c, L), x.dtype),
        grid_spec=pltpu.PrefetchScalarGridSpec(
            num_scalar_prefetch=0,
            grid=(bs, nl),
            in_specs=[
                pl.BlockSpec((1, c, tl), lambda b, j: (b, 0, j)),
                pl.BlockSpec((1, c, 1), lambda b, j: (b, 0, 0)),
            ],
            out_specs=pl.BlockSpec((1, c, tl), lambda b, j: (b, 0, j)),
        ),
        compiler_params=pltpu.CompilerParams(
            dimension_semantics=("parallel", "parallel"),
            vmem_limit_bytes=vmem_limit),
        cost_estimate=cost,
    )(x, s)


# ---------------------------------------------------------------------------
# Public wrapper.
# ---------------------------------------------------------------------------
def se_block(x, w1, w2, *, fused_slab_bytes=None, l_tile=None):
    """SE_Block forward.  x: (bs, c, L), w1: (c//r, c), w2: (c, c//r)."""
    bs, c, L = x.shape
    c_r = w1.shape[0]
    assert w1.shape == (c_r, c) and w2.shape == (c, c_r)

    vmem_limit, fused_budget, l_tile_budget = _budgets()
    if fused_slab_bytes is None:
        fused_slab_bytes = fused_budget

    # Pre-transpose AND pre-cast the tiny weights once in the wrapper.
    w1t = jnp.transpose(w1).astype(jnp.float32)   # (c, c_r)
    w2t = jnp.transpose(w2).astype(jnp.float32)   # (c_r, c)

    itemsize = jnp.dtype(x.dtype).itemsize
    per_batch_bytes = c * L * itemsize

    if l_tile is None and per_batch_bytes <= fused_slab_bytes:
        # Fused single pass over x (2 HBM passes).  Pack several batch rows per
        # grid step to amortize per-step overhead, but keep >= ~8 steps (when
        # bs allows) so adjacent-step DMAs overlap and megacore can split the
        # batch axis.
        # TODO(synk): for L < 128 the lane dim is padded to 128; a lane-dense
        # (bs, c*L) layout would need an in-kernel relayout, not done here.
        tb = max(1, fused_slab_bytes // per_batch_bytes)
        tb = max(1, min(tb, pl.cdiv(bs, 8), bs))
        return _se_fused(x, w1t, w2t, tb, vmem_limit)

    # Large c*L: (1) per-(b, c) sums, (2) tiny excitation GEMMs batched over bs
    # in plain JAX, (3) stream out = x * s.  Ragged last L-tile is masked in
    # the reduction, so any L works with fixed, well-amortized tiles.
    tl = l_tile if l_tile is not None else _pick_l_tile(L, c, itemsize, l_tile_budget)
    sums = _se_sums(x, tl, vmem_limit)                        # (bs, c, 1), f32
    y = sums[:, :, 0] * jnp.float32(1.0 / L)                  # (bs, c), f32
    h = jnp.maximum(y @ w1t, 0.0)                             # (bs, c_r)
    s = jax.nn.sigmoid(h @ w2t).reshape(bs, c, 1)             # (bs, c, 1), f32
    return _se_apply(x, s, tl, vmem_limit)


def se_block_ref(x, w1, w2):
    """Pure-JAX reference mirroring the PyTorch forward."""
    y = jnp.mean(x.astype(jnp.float32), axis=-1)   # (bs, c)
    y = jnp.maximum(y @ w1.T.astype(jnp.float32), 0.0)
    y = jax.nn.sigmoid(y @ w2.T.astype(jnp.float32))
    return (x * y[:, :, None].astype(x.dtype)).astype(x.dtype)


if __name__ == "__main__":
    key = jax.random.PRNGKey(0)
    kx, k1, k2, kx2, k3, k4, kx3, k5, k6 = jax.random.split(key, 9)

    # --- Test 1: small shapes matching the module (fused single-pass path) ---
    bs, c, L, r = 2, 32, 16, 16
    c_r = c // r
    x = jax.random.normal(kx, (bs, c, L), dtype=jnp.float32)
    w1 = jax.random.uniform(k1, (c_r, c), minval=-1.0 / c ** 0.5,
                            maxval=1.0 / c ** 0.5, dtype=jnp.float32)
    w2 = jax.random.uniform(k2, (c, c_r), minval=-1.0 / c_r ** 0.5,
                            maxval=1.0 / c_r ** 0.5, dtype=jnp.float32)

    out = jax.block_until_ready(se_block(x, w1, w2))
    ref = se_block_ref(x, w1, w2)
    assert out.shape == (bs, c, L)
    assert jnp.allclose(out, ref, atol=1e-5, rtol=1e-5)

    # --- Test 2: two-pass streaming path with a ragged last L-tile ---
    bs2, c2, L2, r2 = 2, 128, 600, 16
    cr2 = c2 // r2
    x2 = jax.random.normal(kx2, (bs2, c2, L2), dtype=jnp.float32)
    w1b = jax.random.uniform(k3, (cr2, c2), minval=-1.0 / c2 ** 0.5,
                             maxval=1.0 / c2 ** 0.5, dtype=jnp.float32)
    w2b = jax.random.uniform(k4, (c2, cr2), minval=-1.0 / cr2 ** 0.5,
                             maxval=1.0 / cr2 ** 0.5, dtype=jnp.float32)

    out2 = jax.block_until_ready(se_block(x2, w1b, w2b, l_tile=256))
    ref2 = se_block_ref(x2, w1b, w2b)
    assert out2.shape == (bs2, c2, L2)
    assert jnp.allclose(out2, ref2, atol=1e-4, rtol=1e-4)

    # --- Test 3: two-pass streaming path, exactly divisible L (no mask) ---
    bs3, c3, L3, r3 = 2, 64, 512, 16
    cr3 = c3 // r3
    x3 = jax.random.normal(kx3, (bs3, c3, L3), dtype=jnp.float32)
    w1c = jax.random.uniform(k5, (cr3, c3), minval=-1.0 / c3 ** 0.5,
                             maxval=1.0 / c3 ** 0.5, dtype=jnp.float32)
    w2c = jax.random.uniform(k6, (c3, cr3), minval=-1.0 / cr3 ** 0.5,
                             maxval=1.0 / cr3 ** 0.5, dtype=jnp.float32)

    out3 = jax.block_until_ready(se_block(x3, w1c, w2c, l_tile=128))
    ref3 = se_block_ref(x3, w1c, w2c)
    assert out3.shape == (bs3, c3, L3)
    assert jnp.allclose(out3, ref3, atol=1e-4, rtol=1e-4)

    print("KERNEL_OK")
</pallas_src>

<mosaic_0001>
module attributes {stable_mosaic.version = 11 : i64} {
  func.func @_se_fused_kernel(%arg0: i32, %arg1: memref<1x32x16xf32, #tpu.memory_space<vmem>>, %arg2: memref<32x2xf32, #tpu.memory_space<vmem>>, %arg3: memref<2x32xf32, #tpu.memory_space<vmem>>, %arg4: memref<1x32x16xf32, #tpu.memory_space<vmem>>) attributes {dimension_semantics = [#tpu.dimension_semantics<parallel>], iteration_bounds = array<i64: 2>, scalar_prefetch = 0 : i64, scratch_operands = 0 : i64, tpu.core_type = #tpu.core_type<tc>, window_params = [{transform_indices = @transform_0, window_bounds = array<i64: 1, 32, 16>}, {pipeline_mode = #tpu.pipeline_mode<synchronous>, transform_indices = @transform_1, window_bounds = array<i64: 32, 2>}, {pipeline_mode = #tpu.pipeline_mode<synchronous>, transform_indices = @transform_2, window_bounds = array<i64: 2, 32>}, {transform_indices = @transform_3, window_bounds = array<i64: 1, 32, 16>}]} {
    %c0 = arith.constant 0 : index
    %c0_0 = arith.constant 0 : index
    %c0_1 = arith.constant 0 : index
    %0 = vector.load %arg1[%c0, %c0_0, %c0_1] : memref<1x32x16xf32, #tpu.memory_space<vmem>>, vector<1x32x16xf32>
    %cst = arith.constant dense<0.000000e+00> : vector<1x32xf32>
    %1 = vector.multi_reduction <add>, %0, %cst [2] : vector<1x32x16xf32> to vector<1x32xf32>
    %cst_2 = arith.constant 6.250000e-02 : f32
    %2 = vector.broadcast %cst_2 : f32 to vector<1x32xf32>
    %3 = arith.mulf %1, %2 : vector<1x32xf32>
    %c0_3 = arith.constant 0 : index
    %c0_4 = arith.constant 0 : index
    %4 = vector.load %arg2[%c0_3, %c0_4] : memref<32x2xf32, #tpu.memory_space<vmem>>, vector<32x2xf32>
    %cst_5 = arith.constant dense<0.000000e+00> : vector<1x2xf32>
    %5 = tpu.matmul %3, %4, %cst_5 {dimension_numbers = #tpu.dot_dimension_numbers<[1], [0], [0], [1], [0, 0, 1, 1], [], []>} : vector<1x32xf32>, vector<32x2xf32>, vector<1x2xf32> -> vector<1x2xf32>
    %cst_6 = arith.constant 0.000000e+00 : f32
    %6 = vector.broadcast %cst_6 : f32 to vector<1x2xf32>
    %7 = arith.maximumf %5, %6 : vector<1x2xf32>
    %c0_7 = arith.constant 0 : index
    %c0_8 = arith.constant 0 : index
    %8 = vector.load %arg3[%c0_7, %c0_8] : memref<2x32xf32, #tpu.memory_space<vmem>>, vector<2x32xf32>
    %cst_9 = arith.constant dense<0.000000e+00> : vector<1x32xf32>
    %9 = tpu.matmul %7, %8, %cst_9 {dimension_numbers = #tpu.dot_dimension_numbers<[1], [0], [0], [1], [0, 0, 1, 1], [], []>} : vector<1x2xf32>, vector<2x32xf32>, vector<1x32xf32> -> vector<1x32xf32>
    %10 = arith.negf %9 : vector<1x32xf32>
    %11 = math.exp %10 : vector<1x32xf32>
    %cst_10 = arith.constant 1.000000e+00 : f32
    %12 = vector.broadcast %cst_10 : f32 to vector<1x32xf32>
    %13 = arith.addf %12, %11 : vector<1x32xf32>
    %14 = arith.divf %12, %13 : vector<1x32xf32>
    %c0_11 = arith.constant 0 : index
    %c0_12 = arith.constant 0 : index
    %c0_13 = arith.constant 0 : index
    %15 = vector.load %arg1[%c0_11, %c0_12, %c0_13] : memref<1x32x16xf32, #tpu.memory_space<vmem>>, vector<1x32x16xf32>
    %16 = vector.shape_cast %14 : vector<1x32xf32> to vector<1x32x1xf32>
    %17 = vector.broadcast %16 : vector<1x32x1xf32> to vector<1x32x16xf32>
    %18 = arith.mulf %15, %17 : vector<1x32x16xf32>
    %c0_14 = arith.constant 0 : index
    %c0_15 = arith.constant 0 : index
    %c0_16 = arith.constant 0 : index
    %19 = vector.load %arg4[%c0_14, %c0_15, %c0_16] : memref<1x32x16xf32, #tpu.memory_space<vmem>>, vector<1x32x16xf32>
    tpu.vector_store %arg4[%c0_14, %c0_15, %c0_16], %18 {strides = array<i32>} : memref<1x32x16xf32, #tpu.memory_space<vmem>>, vector<1x32x16xf32>,
    return
  }
  func.func @transform_0(%arg0: i32) -> (i32, i32, i32) {
    %c0_i32 = arith.constant 0 : i32
    %c0_i32_0 = arith.constant 0 : i32
    %c0_i32_1 = arith.constant 0 : i32
    return %arg0, %c0_i32, %c0_i32_0 : i32, i32, i32
  }
  func.func @transform_1(%arg0: i32) -> (i32, i32) {
    %c0_i32 = arith.constant 0 : i32
    %c0_i32_0 = arith.constant 0 : i32
    %c0_i32_1 = arith.constant 0 : i32
    return %c0_i32, %c0_i32_0 : i32, i32
  }
  func.func @transform_2(%arg0: i32) -> (i32, i32) {
    %c0_i32 = arith.constant 0 : i32
    %c0_i32_0 = arith.constant 0 : i32
    %c0_i32_1 = arith.constant 0 : i32
    return %c0_i32, %c0_i32_0 : i32, i32
  }
  func.func @transform_3(%arg0: i32) -> (i32, i32, i32) {
    %c0_i32 = arith.constant 0 : i32
    %c0_i32_0 = arith.constant 0 : i32
    %c0_i32_1 = arith.constant 0 : i32
    return %arg0, %c0_i32, %c0_i32_0 : i32, i32, i32
  }
}

</mosaic_0001>

<bundles_post_ra>
// kernel: tpu_custom_call.1
= control target key start
LH: loop header
LB: loop body
LE: loop exit
PB: predicated region body
PF: predicated region fallthrough
CT: control target
= control target key end

     0   :  { %s560_s12 = smov 0   ;;  %s623_s0 = inlined_call_operand.vmem [shape: f32[2,32,16], index: 0, kind: input, shape index: {}]   ;;  %s624_s1 = inlined_call_operand.vmem [shape: f32[32,2], index: 1, kind: input, shape index: {}]   ;;  %s625_s2 = inlined_call_operand.vmem [shape: f32[2,32], index: 2, kind: input, shape index: {}]   ;;  %s626_s3 = inlined_call_operand.vmem [shape: f32[2,32,16], index: 3, kind: output, shape index: {}]  }
   0x1 LB: > { %s468_s13 = sadd.s32 4294967295, %s535_s12   ;;  %p472_p0 = scmp.ge.s32.totalorder %s535_s12, 1  ;;  %s535_s12 = sphi %s560_s12, %s13_s12  }
   0x2   : > { %p137_p1 = scmp.lt.s32.totalorder %s535_s12, 3 }
   0x4   : > { %p138_p2 = pnand %p472_p0, %p137_p1 }
   0x5   : > { %p161_p3 = scmp.lt.s32.totalorder (!%p138_p2), %s468_s13, 1  ;;  %vm175_vm0 = vcmask (!%p138_p2), 130048   ;;  %v192_v8 = vld [vmem:[%s624_s1] sm:$0xff] (!%p138_p2)  ;;  %v193_v9 = vld [vmem:[%s624_s1 + $0x8] sm:$0xff] (!%p138_p2)  ;;  %v537_v10 = vmov (!%p138_p2), 0.0|0.0   ;;  %v194_v12 = vld [vmem:[%s624_s1 + $0x10] sm:$0xff] (!%p138_p2)  ;;  %v200_v16 = vlaneseq (!%p138_p2) }
   0x6   : > { %141 = sbr.rel (%p138_p2) target bundleno = 751 (0x2ef), region = 32  ;;  %508 = vmatprep.subr.bf16.mxu0 (!%p138_p2), %v537_v10  ;;  %v509_v11 = vpack.c.bf16 (!%p138_p2), %v193_v9, %v192_v8  ;;  %v195_v13 = vld [vmem:[%s624_s1 + $0x18] sm:$0xff] (!%p138_p2)  ;;  %vm538_vm1 = vmmov (!%p138_p2), 0   ;;  %v539_v15 = vmov (!%p138_p2), 0.0   ;;  %vm211_vm2 = vcmask (!%p138_p2), 130112  }
   0x7   : > { %v512_v14 = vpack.c.bf16 (!%p138_p2), %v195_v13, %v194_v12  ;;  %500 = vmatprep.mubr.msk.f32.mxu0 (!%p138_p2), %vm538_vm1, %v539_v15  ;;  %503 = vmatprep.subr.mxu1 (!%p138_p2), %v539_v15  ;;  %v201_v17 = vand.u32 (!%p138_p2), 127, %v200_v16  ;;  %v203_v18 = vshrl.u32 (!%p138_p2), %v200_v16, 7  ;;  %vm218_vm3 = vcmask (!%p138_p2), 195712   ;;  %v301_v41 = vld [vmem:[%s625_s2] sm:$0x3] (!%p138_p2) }
   0x8   : > { %510 = vmatpush3.bf16.msra.mxu0 (!%p138_p2), %v509_v11  ;;  %505 = vmatprep.mubr.msk.f32.mxu1 (!%p138_p2), %vm538_vm1, %v539_v15  ;;  %vm225_vm4 = vcmask (!%p138_p2), 261312   ;;  %vm227_vm5 = vcmask (!%p138_p2), 261120   ;;  %vm306_vm6 = vcmask (!%p138_p2), 1041408   ;;  %vm302_vm7 = vcmask (!%p138_p2), 15360  }
   0x9   : > { %511 = vmatprep.subr.bf16.mxu0 (!%p138_p2), %v537_v10  ;;  %v206_v19 = vadd.s32 (!%p138_p2), 4294967288, %v201_v17  ;;  %v220_v20 = vadd.s32 (!%p138_p2), 4294967272, %v201_v17  ;;  %v213_v22 = vadd.s32 (!%p138_p2), 4294967280, %v201_v17  ;;  %v204_v24 = vsub.s32 (!%p138_p2), %v201_v17, %v203_v18  ;;  %504 = vmatpush3.msk.msra.mxu1 (!%p138_p2), %vm306_vm6, %v301_v41 }
   0xa   : > { %v388_v50 = vsub.s32 (!%p138_p2), 0, %v203_v18 }
   0xb   : > { %v209_v26 = vsub.s32 (!%p138_p2), %v206_v19, %v203_v18  ;;  %v223_v27 = vsub.s32 (!%p138_p2), %v220_v20, %v203_v18  ;;  %v216_v28 = vsub.s32 (!%p138_p2), %v213_v22, %v203_v18 }
   0xc   : > { %513 = vmatpush3.bf16.msra.mxu0 (!%p138_p2), %v512_v14 }
   0xd   : > { %s628_s13 = smov (!%p161_p3, %s468_s13), 1 }
   0xe   : > { %s483_s14 = sshll.u32 %s628_s13, 5 }
   0xf   : > { %s165_s17 = scalar_lea.vmem %s623_s0, %s483_s14  ;;  %s170_s30 = scalar_lea.vmem %s626_s3, %s483_s14 }
  0x10   : > { %v576_v0 = vld [vmem:[%s165_s17] sm:$0xff]  ;;  %v578_v1 = vld [vmem:[%s165_s17 + $0x10] sm:$0xff]  ;;  %v580_v2 = vld [vmem:[%s165_s17 + $0x8] sm:$0xff] }
  0x11   : > { %v176_v3 = vsel %vm175_vm0, %v576_v0, 0.0  ;;  %v182_v4 = vsel %vm175_vm0, %v578_v1, 0.0  ;;  %v586_v5 = vld [vmem:[%s165_s17 + $0x18] sm:$0xff]  ;;  %v179_v6 = vsel %vm175_vm0, %v580_v2, 0.0 }
  0x12   : > { %177 = vadd.xlane.f32.xlu0 %v176_v3  ;;  %183 = vadd.xlane.f32.xlu1 %v182_v4  ;;  %v185_v7 = vsel %vm175_vm0, %v586_v5, 0.0 }
  0x16   : > { %180 = vadd.xlane.f32.xlu0 %v179_v6  ;;  %186 = vadd.xlane.f32.xlu1 %v185_v7 }
  0x9f   : > { %v178_v21 = vpop.xlane.xlu0 %177  ;;  %v184_v23 = vpop.xlane.xlu1 %183 }
  0xa0   : > { %v188_v25 = vmul.f32 0.0625, %v178_v21  ;;  %v190_v29 = vmul.f32 0.0625, %v184_v23 }
  0xa2   : > { %v205_v34 = vrot.slane %v188_v25, %v204_v24  ;;  %v217_v37 = vrot.slane %v190_v29, %v216_v28 }
  0xa3   : > { %v181_v30 = vpop.xlane.xlu0 %180  ;;  %v187_v31 = vpop.xlane.xlu1 %186 }
  0xa4   : > { %v189_v32 = vmul.f32 0.0625, %v181_v30  ;;  %v191_v33 = vmul.f32 0.0625, %v187_v31 }
  0xa6   : > { %v210_v35 = vrot.slane %v189_v32, %v209_v26  ;;  %v224_v36 = vrot.slane %v191_v33, %v223_v27 }
  0xa8   : > { %v212_v38 = vsel %vm211_vm2, %v210_v35, %v205_v34 }
  0xa9   : > { %v219_v39 = vsel %vm218_vm3, %v217_v37, %v212_v38 }
  0xaa   : > { %v226_v40 = vsel %vm225_vm4, %v224_v36, %v219_v39 }
  0xab   : > { %501 = vmatmul.mubr.msk.f32.vlgmr.msra.gmra.mrb[0].mxu0 %vm227_vm5, %v226_v40 }
 0x17e   : > { %v296_v42 = vpop.f32.mrb[0].mxu0 }
 0x17f   : > { %v300_v43 = vmax.f32 %v296_v42, 0.0  ;;  %v502_v44 = vpop.f32.mrb[1].mxu0 }
 0x181   : > { %506 = vmatmul.mubr.msk.f32.vlgmr.msra.gmra.mrb[0].mxu1 %vm302_vm7, %v300_v43 }
 0x254   : > { %v376_v45 = vpop.f32.mrb[0].mxu1 }
 0x255   : > { %v480_v46 = vmul.f32 -1.442695, %v376_v45  ;;  %v507_v47 = vpop.f32.mrb[1].mxu1 }
 0x257   : > { %525 = vpow2.f32 %v480_v46 }
 0x261   : > { %v526_v48 = vpop.eup %525 }
 0x262   : > { %v383_v49 = vadd.f32 1.0, %v526_v48 }
 0x264   : > { %527 = vrcp.f32 %v383_v49 }
 0x26e   : > { %v528_v51 = vpop.eup %527 }
 0x26f   : > { %v389_v52 = vrot.slane %v528_v51, %v388_v50 }
 0x271   : > { %395 = vbcast.lane.b32.xlu1 %v389_v52, 264  ;;  %391 = vbcast.lane.b32.xlu0 %v389_v52, 256 }
 0x275   : > { %399 = vbcast.lane.b32.xlu1 %v389_v52, 272 }
 0x279   : > { %403 = vbcast.lane.b32.xlu1 %v389_v52, 280 }
 0x2e3   : > { %v396_v53 = vpop.permute.xlu1 %395  ;;  %v392_v54 = vpop.permute.xlu0 %391 }
 0x2e4   : > { %v406_v55 = vmul.f32 %v396_v53, %v580_v2  ;;  %v405_v56 = vmul.f32 %v392_v54, %v576_v0 }
 0x2e6   : > { %410 = vst.msk [vmem:[%s170_s30 + $0x8] sm:$0xff] %vm175_vm0, %v406_v55  ;;  %409 = vst.msk [vmem:[%s170_s30] sm:$0xff] %vm175_vm0, %v405_v56 }
 0x2e7   : > { %v400_v57 = vpop.permute.xlu1 %399 }
 0x2e8   : > { %v407_v58 = vmul.f32 %v400_v57, %v578_v1 }
 0x2ea   : > { %411 = vst.msk [vmem:[%s170_s30 + $0x10] sm:$0xff] %vm175_vm0, %v407_v58 }
 0x2eb   : > { %v404_v59 = vpop.permute.xlu1 %403 }
 0x2ec   : > { %v408_v60 = vmul.f32 %v404_v59, %v586_v5 }
 0x2ee   : > { %412 = vst.msk [vmem:[%s170_s30 + $0x18] sm:$0xff] %vm175_vm0, %v408_v60 }
 0x2ef PF: > { %s13_s12 = sadd.s32 1, %s535_s12  }
 0x2f0   : > { %p10_p4 = scmp.ge.s32.totalorder %s13_s12, 4  }
 0x2f2   :  { %12 = sbr.rel (!%p10_p4) target bundleno = 1 (0x1), region = 62 }

</bundles_post_ra>
